<compile_context>
chip_gen: v7x
topology: tpu7x:2x2x1
jax: 0.10.0
libtpu: 0.0.40
codegen_flags: <defaults>
</compile_context>

<pallas_src>
import jax
import jax.numpy as jnp
from jax.experimental import pallas as pl
from jax.experimental.pallas import tpu as pltpu


def _pca_forward_kernel(ut_ref, x_ref, o_ref):
    """One grid step: accumulate U^T_tile @ x_tile directly into the f32 output block."""
    d_step = pl.program_id(1)  # reduction axis (last grid axis)

    @pl.when(d_step == 0)
    def _():
        o_ref[...] = jnp.zeros_like(o_ref)

    # (k, td) @ (td, tn) -> (k, tn), accumulated in f32.
    o_ref[...] += jnp.dot(
        ut_ref[...], x_ref[...], preferred_element_type=jnp.float32
    )


def _pick_tile(full, preferred, quantum):
    """Largest multiple of `quantum` that divides `full` and is <= `preferred`.

    Falls back to the full axis extent (always legal for a BlockSpec dim)."""
    if full <= preferred:
        return full
    t = (preferred // quantum) * quantum
    while t >= quantum:
        if full % t == 0:
            return t
        t -= quantum
    return full


def pca_forward(U, x, *, td=1024, tn=2048):
    """Pallas implementation of PCA.forward: returns U.T @ x.

    U: (d, k) float32, x: (d, n) float32  ->  (k, n) float32
    """
    d, k = U.shape
    d2, n = x.shape
    assert d == d2, "U and x must share the feature dimension"

    # Hoist the transpose out of the kernel: U^T is tiny (k*d*4 bytes).
    Ut = U.T  # (k, d)

    # Tile sizes: td must be a multiple of 128 (it is the lane dim of the U^T
    # block) or equal d; tn must be a multiple of 128 or equal n.
    td = _pick_tile(d, td, 128)
    tn = _pick_tile(n, tn, 128)

    n_tiles = pl.cdiv(n, tn)
    d_tiles = pl.cdiv(d, td)
    grid = (n_tiles, d_tiles)  # reduction (d) axis LAST

    return pl.pallas_call(
        _pca_forward_kernel,
        out_shape=jax.ShapeDtypeStruct((k, n), jnp.float32),
        grid_spec=pltpu.PrefetchScalarGridSpec(
            num_scalar_prefetch=0,
            grid=grid,
            in_specs=[
                # U^T tile: all k rows, current feature block.
                pl.BlockSpec((k, td), lambda j, i: (0, i)),
                # x tile: current feature block, current sample block.
                pl.BlockSpec((td, tn), lambda j, i: (i, j)),
            ],
            # Output block is resident across the d (reduction) axis: direct accumulator.
            out_specs=pl.BlockSpec((k, tn), lambda j, i: (0, j)),
        ),
        compiler_params=pltpu.CompilerParams(
            # n axis parallel (megacore on v7x), d axis is the reduction.
            dimension_semantics=("parallel", "arbitrary"),
            vmem_limit_bytes=64 * 1024 * 1024,
        ),
    )(Ut, x)


def init_pca_params(key, num_feature, num_pc):
    """Deterministic synthetic init mirroring PCA.__init__:
    U = QR(uniform(d, k))[0]  (orthonormal columns)."""
    u_raw = jax.random.uniform(key, (num_feature, num_pc), dtype=jnp.float32)
    U, _ = jnp.linalg.qr(u_raw, mode="reduced")
    return U.astype(jnp.float32)


if __name__ == "__main__":
    # Small shapes consistent with the module: num_feature x num_sample data,
    # projected to num_pc components. Tiles chosen to exercise a multi-step
    # (n_tiles x d_tiles) grid with the resident-output accumulator.
    num_feature = 512   # d
    num_pc = 8          # k
    num_sample = 512    # n

    key = jax.random.PRNGKey(0)
    k_u, k_x = jax.random.split(key)

    U = init_pca_params(k_u, num_feature, num_pc)
    x = jax.random.normal(k_x, (num_feature, num_sample), dtype=jnp.float32)

    out = pca_forward(U, x, td=256, tn=256)   # grid = (2, 2)
    out = jax.block_until_ready(out)

    # Sanity check against plain-JAX reference (same semantics as torch U.T @ x).
    ref = U.T @ x
    assert out.shape == (num_pc, num_sample)
    assert jnp.allclose(out, ref, atol=1e-4, rtol=1e-4), "mismatch vs reference"

    print("KERNEL_OK")
</pallas_src>

<mosaic_0001>
module attributes {stable_mosaic.version = 11 : i64} {
  func.func @_pca_forward_kernel(%arg0: i32, %arg1: i32, %arg2: memref<8x256xf32, #tpu.memory_space<vmem>>, %arg3: memref<256x256xf32, #tpu.memory_space<vmem>>, %arg4: memref<8x256xf32, #tpu.memory_space<vmem>>) attributes {dimension_semantics = [#tpu.dimension_semantics<parallel>, #tpu.dimension_semantics<arbitrary>], iteration_bounds = array<i64: 2, 2>, scalar_prefetch = 0 : i64, scratch_operands = 0 : i64, tpu.core_type = #tpu.core_type<tc>, window_params = [{transform_indices = @transform_0, window_bounds = array<i64: 8, 256>}, {transform_indices = @transform_1, window_bounds = array<i64: 256, 256>}, {transform_indices = @transform_2, window_bounds = array<i64: 8, 256>}]} {
    %c0_i32 = arith.constant 0 : i32
    %0 = arith.cmpi eq, %arg1, %c0_i32 : i32
    %1 = arith.extui %0 : i1 to i32
    %c0_i32_0 = arith.constant 0 : i32
    %2 = arith.cmpi ne, %1, %c0_i32_0 : i32
    scf.if %2 {
      %cst_8 = arith.constant 0.000000e+00 : f32
      %9 = vector.broadcast %cst_8 : f32 to vector<8x256xf32>
      %c0_9 = arith.constant 0 : index
      %c0_10 = arith.constant 0 : index
      %10 = vector.load %arg4[%c0_9, %c0_10] : memref<8x256xf32, #tpu.memory_space<vmem>>, vector<8x256xf32>
      tpu.vector_store %arg4[%c0_9, %c0_10], %9 {strides = array<i32>} : memref<8x256xf32, #tpu.memory_space<vmem>>, vector<8x256xf32>,
    } else {
    }
    %c0 = arith.constant 0 : index
    %c0_1 = arith.constant 0 : index
    %3 = vector.load %arg4[%c0, %c0_1] : memref<8x256xf32, #tpu.memory_space<vmem>>, vector<8x256xf32>
    %c0_2 = arith.constant 0 : index
    %c0_3 = arith.constant 0 : index
    %4 = vector.load %arg2[%c0_2, %c0_3] : memref<8x256xf32, #tpu.memory_space<vmem>>, vector<8x256xf32>
    %c0_4 = arith.constant 0 : index
    %c0_5 = arith.constant 0 : index
    %5 = vector.load %arg3[%c0_4, %c0_5] : memref<256x256xf32, #tpu.memory_space<vmem>>, vector<256x256xf32>
    %cst = arith.constant dense<0.000000e+00> : vector<8x256xf32>
    %6 = tpu.matmul %4, %5, %cst {dimension_numbers = #tpu.dot_dimension_numbers<[1], [0], [0], [1], [0, 0, 1, 1], [], []>} : vector<8x256xf32>, vector<256x256xf32>, vector<8x256xf32> -> vector<8x256xf32>
    %7 = arith.addf %3, %6 : vector<8x256xf32>
    %c0_6 = arith.constant 0 : index
    %c0_7 = arith.constant 0 : index
    %8 = vector.load %arg4[%c0_6, %c0_7] : memref<8x256xf32, #tpu.memory_space<vmem>>, vector<8x256xf32>
    tpu.vector_store %arg4[%c0_6, %c0_7], %7 {strides = array<i32>} : memref<8x256xf32, #tpu.memory_space<vmem>>, vector<8x256xf32>,
    return
  }
  func.func @transform_0(%arg0: i32, %arg1: i32) -> (i32, i32) {
    %c0_i32 = arith.constant 0 : i32
    %c0_i32_0 = arith.constant 0 : i32
    return %c0_i32, %arg1 : i32, i32
  }
  func.func @transform_1(%arg0: i32, %arg1: i32) -> (i32, i32) {
    %c0_i32 = arith.constant 0 : i32
    return %arg1, %arg0 : i32, i32
  }
  func.func @transform_2(%arg0: i32, %arg1: i32) -> (i32, i32) {
    %c0_i32 = arith.constant 0 : i32
    %c0_i32_0 = arith.constant 0 : i32
    return %c0_i32, %arg0 : i32, i32
  }
}

</mosaic_0001>

<bundles_post_ra>
// kernel: tpu_custom_call.1
= control target key start
LH: loop header
LB: loop body
LE: loop exit
PB: predicated region body
PF: predicated region fallthrough
CT: control target
= control target key end

     0   :  { %s1373_s0 = inlined_call_operand.hbm [shape: f32[8,512], index: 0, kind: input, shape index: {}]   ;;  %s1374_s1 = inlined_call_operand.hbm [shape: f32[512,512], index: 1, kind: input, shape index: {}]   ;;  %s1375_s2 = inlined_call_operand.hbm [shape: f32[8,512], index: 2, kind: output, shape index: {}]  }
   0x1   :  { %1383 = sst [smem:[#allocation18_spill]] %s1373_s0 }
   0x2   :  { %7 = vsyncpa [#allocation3], 0 }
   0x3   :  { %9 = vsyncpa [#allocation3 + $0x1], 0 }
   0x4   :  { %10 = vsyncpa [#allocation6], 0 }
   0x5   :  { %12 = vsyncpa [#allocation6 + $0x1], 0 }
   0x6   :  { %13 = vsyncpa [#allocation4], 0 }
   0x7   :  { %15 = vsyncpa [#allocation4 + $0x1], 0  ;;  %s950_s9 = smov 0   ;;  %s952_s10 = smov 0  }
   0x8   :  { %s954_s11 = smov 0   ;;  %s956_s12 = smov 0  }
   0x9   :  { %s958_s13 = smov 0   ;;  %s960_s14 = smov 0  }
   0xa   :  { %s962_s15 = smov 0   ;;  %s964_s16 = smov 0  }
   0xb   :  { %s966_s17 = smov 0   ;;  %s968_s18 = smov 0  }
   0xc   :  { %s970_s19 = smov 0   ;;  %s972_s20 = smov 0  }
   0xd   :  { %s974_s21 = smov 0   ;;  %s976_s22 = smov 0  }
   0xe LB: > { %1384 = sst [smem:[#allocation11_spill]] %s906_s17  ;;  %s492_s23 = sadd.s32 4294967295, %s926_s22   ;;  %s926_s22 = sphi %s976_s22, %s21_s22   ;;  %s922_s21 = sphi %s974_s21, %s1415_s21   ;;  %s918_s20 = sphi %s972_s20, %s1427_s20   ;;  %s914_s19 = sphi %s970_s19, %s1413_s19   ;;  %s910_s18 = sphi %s968_s18, %s1426_s18   ;;  %s906_s17 = sphi %s966_s17, %s1425_s17   ;;  %s902_s16 = sphi %s964_s16, %s1424_s16   ;;  %s898_s15 = sphi %s962_s15, %s1423_s15   ;;  %s894_s14 = sphi %s960_s14, %s1422_s14   ;;  %s890_s13 = sphi %s958_s13, %s1421_s13   ;;  %s886_s12 = sphi %s956_s12, %s1420_s12   ;;  %s882_s11 = sphi %s954_s11, %s1419_s11   ;;  %s878_s10 = sphi %s952_s10, %s1418_s10   ;;  %s874_s9 = sphi %s950_s9, %s1417_s9  }
   0xf   : > { %1385 = sst [smem:[#allocation12_spill]] %s922_s21  ;;  %s493_s24 = sadd.s32 4294967294, %s926_s22  }
  0x10   : > { %s30_s25 = sadd.s32 1, %s918_s20  ;;  %s33_s26 = sadd.s32 1, %s922_s21 }
  0x11   : > { %p31_p0 = scmp.ge.s32.totalorder %s30_s25, 2  ;;  %s40_s27 = sadd.s32 1, %s906_s17 }
  0x12   : > { %p47_p1 = scmp.ne.s32.totalorder %s906_s17, %s902_s16  ;;  %p48_p2 = scmp.eq.s32.totalorder %s926_s22, 0 }
  0x13   : > { %s1429_s25 = smov (%p31_p0, %s30_s25), 0  ;;  %s1431_s26 = smov (!%p31_p0, %s33_s26), %s922_s21 }
  0x14   : > { %1386 = sst [smem:[#allocation13_spill]] %s1429_s25  ;;  %s37_s28 = ssub.s32 %s918_s20, %s1429_s25 }
  0x15   : > { %p1033_p3 = por %p48_p2, %p47_p1  ;;  %p35_p4 = scmp.ge.s32.totalorder %s1431_s26, 2 }
  0x16   : > { %p38_p5 = scmp.eq.s32.totalorder %s37_s28, 0  ;;  %p53_p6 = scmp.ne.s32.totalorder %s902_s16, %s898_s15 }
  0x17   : > { %p1040_p7 = scmp.eq.s32.totalorder %s492_s23, 0  ;;  %s1433_s26 = smov (%p35_p4, %s1431_s26), 0 }
  0x18   : > { %1389 = sst [smem:[#allocation14_spill]] %s1433_s26  ;;  %s64_s5 = ssub.s32 %s922_s21, %s1433_s26 }
  0x19   : > { %s1047_s3 = scalar_select %p38_p5, %s906_s17, %s40_s27  }
  0x1a   : > { %p1051_p8 = por %p1040_p7, %p53_p6  ;;  %s65_s6 = sor.u32 %s64_s5, %s37_s28 }
  0x1b   : > { %1390 = sst [smem:[#allocation15_spill]] %s1047_s3  ;;  %s68_s7 = sadd.s32 1, %s894_s14 }
  0x1c   : > { %s1391_s4 = scalar_select %p1051_p8, 1, 0 }
  0x1d   : > { %p66_p9 = scmp.eq.s32.totalorder %s65_s6, 0  ;;  %p75_p10 = scmp.ne.s32.totalorder %s894_s14, %s890_s13 }
  0x1e   : > { %p81_p11 = scmp.ne.s32.totalorder %s890_s13, %s886_s12  ;;  %p92_p12 = scmp.eq.s32.totalorder %s64_s5, 0 }
  0x1f   : > { %s1063_s8 = scalar_select %p66_p9, %s894_s14, %s68_s7  }
  0x20   : > { %p1067_p13 = por %p75_p10, %p48_p2  ;;  %p1073_p0 = por %p81_p11, %p1040_p7 }
  0x21   : > { %1392 = sst [smem:[#allocation16_spill]] %s1063_s8  ;;  %s94_s28 = sadd.s32 1, %s882_s11 }
  0x22   : > { %s1394_s27 = scalar_select %p1073_p0, 1, 0 }
  0x23   : > { %p104_p1 = scmp.ne.s32.totalorder %s882_s11, %s878_s10  ;;  %p105_p4 = scmp.eq.s32.totalorder %s492_s23, 3 }
  0x24   : > { %s1081_s6 = scalar_select %p92_p12, %s882_s11, %s94_s28  }
  0x25   : > { %p110_p5 = scmp.ne.s32.totalorder %s878_s10, %s874_s9  ;;  %p111_p2 = scmp.eq.s32.totalorder %s493_s24, 3 }
  0x26   : > { %1395 = sst [smem:[#allocation17_spill]] %s1081_s6  ;;  %p1089_p6 = por %p105_p4, %p104_p1 }
  0x27   : > { %p598_p7 = scmp.lt.s32.totalorder %s926_s22, 4  ;;  %p1094_p9 = por %p111_p2, %p110_p5 }
  0x28   : > { %s1396_s12 = scalar_select %p1089_p6, 1, 0 }
  0x29   : > { %s1397_s30 = scalar_select %p1094_p9, 1, 0 }
  0x2a   : > { %s131_s5 = sand.u32 1, %s906_s17   ;;  %s514_s28 = sshll.u32 %s918_s20, 8 }
  0x2b   : > { %s496_s7 = sshll.u32 %s131_s5, 4  ;;  %s1398_s0 = sld [smem:[#allocation18_spill]] }
  0x2c   : > { %s135_s24 = scalar_lea.vmem [#allocation2], %s496_s7  ;;  %p1109_p10 = pnand %p598_p7, %p1033_p3 }
  0x2d   : > { %s143_s3 = sshll.u32 %s135_s24, 4  ;;  %p1116_p11 = pnand %p598_p7, %p1067_p13  ;;  %s1105_s3 = int_to_ptr.vmem [resolvable:$true] %s143_s3 }
  0x2e   : > { %s132_s26 = scalar_lea.sflag [#allocation3], %s131_s5  ;;  %p718_p4 = pneg %p1109_p10 }
  0x31   : > { %s1103_s23 = scalar_lea.hbm %s1398_s0, %s514_s28  ;;  %s721_s24 = scalar_lea.hbm %s1398_s0, 512 }
  0x32   : > { %s716_s7 = scalar_lea.hbm %s1103_s23, 256  ;;  %p722_p13 = scmp.lt.u32.totalorder %s1103_s23, %s1398_s0 }
  0x33   : > { %p717_p1 = scmp.ne.s32.totalorder %s1103_s23, %s716_s7  ;;  %p723_p2 = scmp.lt.u32.totalorder %s721_s24, %s716_s7 }
  0x34   : > { %p725_p12 = scmp.lt.u32.totalorder %s716_s7, %s1103_s23 }
  0x35   : > { %p719_p3 = pnand %p718_p4, %p717_p1  ;;  %p724_p7 = por %p723_p2, %p722_p13 }
  0x37   : > { %p720_p5 = pneg %p719_p3  ;;  %p726_p9 = por %p725_p12, %p724_p7 }
  0x39   : > { %p727_p6 = pnand %p726_p9, %p720_p5 }
  0x3b   : > { %730 = shalt.err (!%p727_p6)
}
  0x3c   : > { %s731_s5 = scalar_lea.vmem %s1105_s3, 256  ;;  %s928_s29 = smov [#allocation2]  }
  0x3d   : > { %p732_p1 = scmp.ne.s32.totalorder %s1105_s3, %s731_s5  ;;  %s736_s28 = sshll.u32 %s928_s29, 4  ;;  %s737_s28 = int_to_ptr.vmem [resolvable:$false] %s736_s28 }
  0x3e   : > { %s738_s17 = scalar_lea.vmem %s737_s28, 512  ;;  %p739_p8 = scmp.lt.s32.totalorder %s1105_s3, %s737_s28 }
  0x3f   : > { %p734_p3 = pnand %p732_p1, %p718_p4  ;;  %p740_p13 = scmp.lt.s32.totalorder %s738_s17, %s731_s5 }
  0x41   : > { %p735_p0 = pneg %p734_p3  ;;  %p741_p2 = por %p740_p13, %p739_p8 }
  0x43   : > { %p742_p12 = pnand %p741_p2, %p735_p0 }
  0x45   : > { %745 = shalt.err (!%p742_p12)
}
  0x46   : > { %590 = dma.hbm_to_vmem [thread:$0]  (!%p1109_p10), %s1103_s23, 256, %s1105_s3, %s132_s26  }
  0x47   : > { %p172_p6 = scmp.lt.s32.totalorder %s926_s22, 5  ;;  %s150_s7 = sand.u32 1, %s894_s14  }
  0x48   : > { %s501_s24 = sshll.u32 %s922_s21, 1  ;;  %p1401_p9 = scmp.ge.s32.totalorder %s926_s22, 1 }
  0x49   : > { %s499_s5 = sshll.u32 %s150_s7, 9  ;;  %s1403_s8 = sshll.u32 %s918_s20, 7 }
  0x4a   : > { %p1151_p4 = pnand %p1401_p9, %p172_p6  ;;  %s161_s29 = sadd.s32 %s1403_s8, %s501_s24 }
  0x4b   : > { %s503_s28 = sshll.u32 %s161_s29, 7  ;;  %s154_s3 = scalar_lea.vmem [#allocation5], %s499_s5 }
  0x4c   : > { %s1160_s6 = scalar_lea.hbm %s1374_s1, %s503_s28  ;;  %s164_s23 = sshll.u32 %s154_s3, 4  ;;  %s1162_s23 = int_to_ptr.vmem [resolvable:$true] %s164_s23 }
  0x4d   : > { %s1164_s26 = scalar_lea.sflag [#allocation6], %s150_s7  ;;  %s746_s21 = scalar_lea.hbm %s1160_s6, 8192 }
  0x4e   : > { %p747_p8 = scmp.ne.s32.totalorder %s1160_s6, %s746_s21  ;;  %p748_p0 = pneg %p1116_p11 }
  0x4f   : > { %s751_s8 = scalar_lea.hbm %s1374_s1, 32768  ;;  %p752_p7 = scmp.lt.u32.totalorder %s1160_s6, %s1374_s1 }
  0x50   : > { %p749_p10 = pnand %p748_p0, %p747_p8  ;;  %p753_p1 = scmp.lt.u32.totalorder %s751_s8, %s746_s21 }
  0x51   : > { %p755_p13 = scmp.lt.u32.totalorder %s746_s21, %s1160_s6 }
  0x52   : > { %p750_p5 = pneg %p749_p10  ;;  %p754_p3 = por %p753_p1, %p752_p7 }
  0x54   : > { %p756_p2 = por %p755_p13, %p754_p3 }
  0x56   : > { %p757_p12 = pnand %p756_p2, %p750_p5 }
  0x58   : > { %760 = shalt.err (!%p757_p12)
}
  0x59   : > { %s761_s7 = scalar_lea.vmem %s1162_s23, 8192  ;;  %s929_s5 = smov [#allocation5]  }
  0x5a   : > { %p762_p6 = scmp.ne.s32.totalorder %s1162_s23, %s761_s7  ;;  %s766_s17 = sshll.u32 %s929_s5, 4  ;;  %s767_s17 = int_to_ptr.vmem [resolvable:$false] %s766_s17 }
  0x5b   : > { %s768_s3 = scalar_lea.vmem %s767_s17, 16384  ;;  %p769_p10 = scmp.lt.s32.totalorder %s1162_s23, %s767_s17 }
  0x5c   : > { %p764_p9 = pnand %p762_p6, %p748_p0  ;;  %p770_p7 = scmp.lt.s32.totalorder %s768_s3, %s761_s7 }
  0x5e   : > { %p765_p8 = pneg %p764_p9  ;;  %p771_p1 = por %p770_p7, %p769_p10 }
  0x60   : > { %p772_p3 = pnand %p771_p1, %p765_p8 }
  0x62   : > { %775 = shalt.err (!%p772_p3)
}
  0x63   : > { %s930_s21 = smov 512   ;;  %s931_s0 = smov 256  }
  0x64   : > { %s932_s24 = smov 16   ;;  %176 = sbr.rel (%p1151_p4) target bundleno = 417 (0x1a1), region = 28 }
  0x65   : > { %593 = dma.hbm_to_vmem [thread:$0]  (!%p1116_p11), %s1160_s6, 8192, %s1162_s23, %s1164_s26, %s930_s21, %s931_s0, %s932_s24  }
  0x66   : > { %s178_s8 = sand.u32 (!%p1151_p4), 1, %s902_s16   ;;  %p1404_p0 = scmp.ne.s32.totalorder (!%p1151_p4), %s1391_s4, 0 }
  0x67   : > { %s1195_s29 = sshll.u32 (!%p1151_p4), %s178_s8, 4  ;;  %s179_s28 = scalar_lea.sflag (!%p1151_p4), [#allocation3], %s178_s8 }
  0x68   : > { %s182_s7 = scalar_lea.vmem (!%p1151_p4), [#allocation2], %s1195_s29 }
  0x6b   : > { %861 = dma.done.wait (%p1404_p0), %s179_s28, 256  }
  0x6c   : > { %863 = vsyncadd (%p1404_p0), %s179_s28, 4294967040  ;;  %s187_s25 = sand.u32 1, %s890_s13   ;;  %p1405_p11 = scmp.ne.s32.totalorder %s1394_s27, 0 }
  0x6d   : > { %s506_s6 = sshll.u32 %s187_s25, 9  ;;  %s188_s23 = scalar_lea.sflag [#allocation6], %s187_s25 }
  0x6e   : > { %s1203_s15 = scalar_lea.vmem [#allocation5], %s506_s6 }
  0x6f   : > { %865 = dma.done.wait (%p1405_p11), %s188_s23, 8192  }
  0x70   : > { %867 = vsyncadd (%p1405_p11), %s188_s23, 4294959104  ;;  %s214_s26 = sand.u32 1, %s878_s10   ;;  %p508_p4 = scmp.ne.s32.totalorder %s910_s18, 0 }
  0x71   : > { %s507_s5 = sshll.u32 %s214_s26, 4  ;;  %v933_v0 = vmov (!%p508_p4), 0.0  }
  0x72   : > { %s1212_s17 = scalar_lea.vmem [#allocation7], %s507_s5  ;;  %224 = sbr.rel (%p508_p4) target bundleno = 121 (0x79), region = 40 }
  0x73   : > { %225 = vst [vmem:[%s1212_s17] sm:$0xff] (!%p508_p4), %v933_v0  ;;  %226 = vst [vmem:[%s1212_s17 + $0x8] sm:$0xff] (!%p508_p4), %v933_v0 }
  0x79 PF: > { %v232_v1 = vld [vmem:[%s1203_s15 + $0x8] sm:$0xff]  ;;  %v234_v2 = vld [vmem:[%s1203_s15 + $0x18] sm:$0xff]  ;;  %v231_v3 = vld [vmem:[%s1203_s15] sm:$0xff]  ;;  %s516_s18 = sshll.u32 %s914_s19, 8  ;;  %s385_s4 = sshll.u32 %s1212_s17, 4  ;;  %s1294_s4 = int_to_ptr.vmem [resolvable:$true] %s385_s4 }
  0x7a   : > { %v517_v4 = vpack.c.bf16 %v234_v2, %v232_v1  ;;  %v233_v5 = vld [vmem:[%s1203_s15 + $0x10] sm:$0xff]  ;;  %v236_v6 = vld [vmem:[%s1203_s15 + $0x28] sm:$0xff]  ;;  %v238_v7 = vld [vmem:[%s1203_s15 + $0x38] sm:$0xff]  ;;  %s1292_s21 = scalar_lea.hbm %s1375_s2, %s516_s18  ;;  %s371_s0 = scalar_lea.sflag [#allocation4], %s214_s26 }
  0x7b   : > { %v519_v8 = vpack.c.bf16 %v233_v5, %v231_v3  ;;  %v521_v9 = vpack.c.bf16 %v238_v7, %v236_v6  ;;  %v235_v10 = vld [vmem:[%s1203_s15 + $0x20] sm:$0xff]  ;;  %v237_v11 = vld [vmem:[%s1203_s15 + $0x30] sm:$0xff]  ;;  %v240_v12 = vld [vmem:[%s1203_s15 + $0x48] sm:$0xff]  ;;  %s776_s19 = scalar_lea.vmem %s1294_s4, 256  ;;  %p1406_p13 = scmp.ne.s32.totalorder %s1396_s12, 0 }
  0x7c   : > { %518 = vmatprep.subr.bf16.mxu0 %v517_v4  ;;  %v242_v13 = vld [vmem:[%s1203_s15 + $0x58] sm:$0xff]  ;;  %v523_v14 = vpack.c.bf16 %v237_v11, %v235_v10  ;;  %v239_v16 = vld [vmem:[%s1203_s15 + $0x40] sm:$0xff]  ;;  %v241_v17 = vld [vmem:[%s1203_s15 + $0x50] sm:$0xff]  ;;  %p777_p5 = scmp.ne.s32.totalorder %s1294_s4, %s776_s19  ;;  %s934_s24 = smov [#allocation7]  }
  0x7d   : > { %520 = vmatpush1.bf16.msra.mxu0 %v519_v8  ;;  %v525_v15 = vpack.c.bf16 %v242_v13, %v240_v12  ;;  %v244_v18 = vld [vmem:[%s1203_s15 + $0x68] sm:$0xff]  ;;  %v246_v19 = vld [vmem:[%s1203_s15 + $0x78] sm:$0xff]  ;;  %v527_v20 = vpack.c.bf16 %v241_v17, %v239_v16  ;;  %v243_v22 = vld [vmem:[%s1203_s15 + $0x60] sm:$0xff]  ;;  %s780_s8 = sshll.u32 %s934_s24, 4  ;;  %s781_s8 = int_to_ptr.vmem [resolvable:$false] %s780_s8 }
  0x7e   : > { %522 = vmatprep.subr.bf16.mxu0 %v521_v9  ;;  %v529_v21 = vpack.c.bf16 %v246_v19, %v244_v18  ;;  %v245_v23 = vld [vmem:[%s1203_s15 + $0x70] sm:$0xff]  ;;  %v248_v24 = vld [vmem:[%s1203_s15 + $0x88] sm:$0xff]  ;;  %v250_v25 = vld [vmem:[%s1203_s15 + $0x98] sm:$0xff]  ;;  %p778_p2 = pnand %p777_p5, %p1406_p13  ;;  %s782_s29 = scalar_lea.vmem %s781_s8, 512 }
  0x7f   : > { %v531_v26 = vpack.c.bf16 %v245_v23, %v243_v22  ;;  %v533_v27 = vpack.c.bf16 %v250_v25, %v248_v24  ;;  %v247_v28 = vld [vmem:[%s1203_s15 + $0x80] sm:$0xff]  ;;  %v249_v29 = vld [vmem:[%s1203_s15 + $0x90] sm:$0xff]  ;;  %v252_v30 = vld [vmem:[%s1203_s15 + $0xa8] sm:$0xff]  ;;  %p783_p6 = scmp.lt.s32.totalorder %s1294_s4, %s781_s8  ;;  %p784_p9 = scmp.lt.s32.totalorder %s782_s29, %s776_s19 }
  0x80   : > { %v254_v31 = vld [vmem:[%s1203_s15 + $0xb8] sm:$0xff]  ;;  %v535_v32 = vpack.c.bf16 %v249_v29, %v247_v28  ;;  %v251_v34 = vld [vmem:[%s1203_s15 + $0xa0] sm:$0xff]  ;;  %v253_v35 = vld [vmem:[%s1203_s15 + $0xb0] sm:$0xff]  ;;  %p779_p12 = pneg %p778_p2 }
  0x81   : > { %524 = vmatpush1.bf16.msra.mxu0 %v523_v14  ;;  %v537_v33 = vpack.c.bf16 %v254_v31, %v252_v30  ;;  %v256_v36 = vld [vmem:[%s1203_s15 + $0xc8] sm:$0xff]  ;;  %v258_v37 = vld [vmem:[%s1203_s15 + $0xd8] sm:$0xff]  ;;  %v539_v38 = vpack.c.bf16 %v253_v35, %v251_v34  ;;  %v255_v40 = vld [vmem:[%s1203_s15 + $0xc0] sm:$0xff]  ;;  %p785_p8 = por %p784_p9, %p783_p6 }
  0x82   : > { %526 = vmatprep.subr.bf16.mxu0 %v525_v15  ;;  %v541_v39 = vpack.c.bf16 %v258_v37, %v256_v36  ;;  %v257_v41 = vld [vmem:[%s1203_s15 + $0xd0] sm:$0xff]  ;;  %v230_v42 = vld [vmem:[%s182_s7 + $0x8] sm:$0xff]  ;;  %v259_v47 = vld [vmem:[%s1203_s15 + $0xe0] sm:$0xff] }
  0x83   : > { %v260_v43 = vld [vmem:[%s1203_s15 + $0xe8] sm:$0xff]  ;;  %v262_v44 = vld [vmem:[%s1203_s15 + $0xf8] sm:$0xff]  ;;  %359 = vmatprep.mubr.f32.mxu0 %v230_v42  ;;  %v543_v45 = vpack.c.bf16 %v257_v41, %v255_v40  ;;  %v261_v48 = vld [vmem:[%s1203_s15 + $0xf0] sm:$0xff]  ;;  %p786_p10 = pnand %p785_p8, %p779_p12 }
  0x84   : > { %v545_v46 = vpack.c.bf16 %v262_v44, %v260_v43  ;;  %v264_v49 = vld [vmem:[%s1203_s15 + $0x108] sm:$0xff]  ;;  %v266_v50 = vld [vmem:[%s1203_s15 + $0x118] sm:$0xff]  ;;  %v547_v51 = vpack.c.bf16 %v261_v48, %v259_v47  ;;  %v263_v53 = vld [vmem:[%s1203_s15 + $0x100] sm:$0xff] }
  0x85   : > { %528 = vmatpush1.bf16.msra.mxu0 %v527_v20  ;;  %v549_v52 = vpack.c.bf16 %v266_v50, %v264_v49  ;;  %v265_v54 = vld [vmem:[%s1203_s15 + $0x110] sm:$0xff]  ;;  %v268_v55 = vld [vmem:[%s1203_s15 + $0x128] sm:$0xff]  ;;  %v270_v56 = vld [vmem:[%s1203_s15 + $0x138] sm:$0xff] }
  0x86   : > { %530 = vmatprep.subr.bf16.mxu0 %v529_v21  ;;  %v551_v57 = vpack.c.bf16 %v265_v54, %v263_v53  ;;  %v553_v58 = vpack.c.bf16 %v270_v56, %v268_v55  ;;  %v267_v59 = vld [vmem:[%s1203_s15 + $0x120] sm:$0xff]  ;;  %v269_v60 = vld [vmem:[%s1203_s15 + $0x130] sm:$0xff]  ;;  %v272_v61 = vld [vmem:[%s1203_s15 + $0x148] sm:$0xff] }
  0x87   : > { %v274_v62 = vld [vmem:[%s1203_s15 + $0x158] sm:$0xff]  ;;  %v555_v63 = vpack.c.bf16 %v269_v60, %v267_v59  ;;  %v271_v1 = vld [vmem:[%s1203_s15 + $0x140] sm:$0xff]  ;;  %v273_v2 = vld [vmem:[%s1203_s15 + $0x150] sm:$0xff] }
  0x88   : > { %v557_v0 = vpack.c.bf16 %v274_v62, %v272_v61  ;;  %v276_v3 = vld [vmem:[%s1203_s15 + $0x168] sm:$0xff]  ;;  %v278_v4 = vld [vmem:[%s1203_s15 + $0x178] sm:$0xff]  ;;  %v559_v5 = vpack.c.bf16 %v273_v2, %v271_v1  ;;  %v275_v7 = vld [vmem:[%s1203_s15 + $0x160] sm:$0xff] }
  0x89   : > { %532 = vmatpush1.bf16.msra.mxu0 %v531_v26  ;;  %v561_v6 = vpack.c.bf16 %v278_v4, %v276_v3  ;;  %v277_v8 = vld [vmem:[%s1203_s15 + $0x170] sm:$0xff]  ;;  %v280_v9 = vld [vmem:[%s1203_s15 + $0x188] sm:$0xff]  ;;  %v282_v10 = vld [vmem:[%s1203_s15 + $0x198] sm:$0xff] }
  0x8a   : > { %534 = vmatprep.subr.bf16.mxu0 %v533_v27  ;;  %v563_v11 = vpack.c.bf16 %v277_v8, %v275_v7  ;;  %v565_v12 = vpack.c.bf16 %v282_v10, %v280_v9  ;;  %v279_v13 = vld [vmem:[%s1203_s15 + $0x180] sm:$0xff]  ;;  %v281_v14 = vld [vmem:[%s1203_s15 + $0x190] sm:$0xff]  ;;  %v284_v15 = vld [vmem:[%s1203_s15 + $0x1a8] sm:$0xff] }
  0x8b   : > { %v286_v16 = vld [vmem:[%s1203_s15 + $0x1b8] sm:$0xff]  ;;  %v567_v17 = vpack.c.bf16 %v281_v14, %v279_v13  ;;  %v283_v19 = vld [vmem:[%s1203_s15 + $0x1a0] sm:$0xff]  ;;  %v285_v20 = vld [vmem:[%s1203_s15 + $0x1b0] sm:$0xff] }
  0x8c   : > { %v569_v18 = vpack.c.bf16 %v286_v16, %v284_v15  ;;  %v288_v21 = vld [vmem:[%s1203_s15 + $0x1c8] sm:$0xff]  ;;  %v290_v22 = vld [vmem:[%s1203_s15 + $0x1d8] sm:$0xff]  ;;  %v571_v23 = vpack.c.bf16 %v285_v20, %v283_v19  ;;  %v287_v25 = vld [vmem:[%s1203_s15 + $0x1c0] sm:$0xff] }
  0x8d   : > { %536 = vmatpush1.bf16.msra.mxu0 %v535_v32  ;;  %v573_v24 = vpack.c.bf16 %v290_v22, %v288_v21  ;;  %v289_v26 = vld [vmem:[%s1203_s15 + $0x1d0] sm:$0xff]  ;;  %v292_v27 = vld [vmem:[%s1203_s15 + $0x1e8] sm:$0xff]  ;;  %v294_v28 = vld [vmem:[%s1203_s15 + $0x1f8] sm:$0xff] }
  0x8e   : > { %538 = vmatprep.subr.bf16.mxu0 %v537_v33  ;;  %v575_v29 = vpack.c.bf16 %v289_v26, %v287_v25  ;;  %v577_v30 = vpack.c.bf16 %v294_v28, %v292_v27  ;;  %v291_v31 = vld [vmem:[%s1203_s15 + $0x1e0] sm:$0xff]  ;;  %v293_v32 = vld [vmem:[%s1203_s15 + $0x1f0] sm:$0xff]  ;;  %v228_v36 = vld [vmem:[%s1212_s17 + $0x8] sm:$0xff] }
  0x8f   : > { %v579_v33 = vpack.c.bf16 %v293_v32, %v291_v31  ;;  %v229_v34 = vld [vmem:[%s182_s7] sm:$0xff] }
  0x90   : > { %v227_v35 = vld [vmem:[%s1212_s17] sm:$0xff] }
  0x91   : > { %540 = vmatpush1.bf16.msra.mxu0 %v539_v38 }
  0x92   : > { %542 = vmatprep.subr.bf16.mxu0 %v541_v39 }
  0x95   : > { %544 = vmatpush1.bf16.msra.mxu0 %v543_v45 }
  0x96   : > { %546 = vmatprep.subr.bf16.mxu0 %v545_v46 }
  0x99   : > { %548 = vmatpush1.bf16.msra.mxu0 %v547_v51 }
  0x9a   : > { %550 = vmatprep.subr.bf16.mxu0 %v549_v52 }
  0x9d   : > { %552 = vmatpush1.bf16.msra.mxu0 %v551_v57 }
  0x9e   : > { %554 = vmatprep.subr.bf16.mxu0 %v553_v58 }
  0xa1   : > { %556 = vmatpush1.bf16.msra.mxu0 %v555_v63 }
  0xa2   : > { %558 = vmatprep.subr.bf16.mxu0 %v557_v0 }
  0xa5   : > { %560 = vmatpush1.bf16.msra.mxu0 %v559_v5 }
  0xa6   : > { %562 = vmatprep.subr.bf16.mxu0 %v561_v6 }
  0xa9   : > { %564 = vmatpush1.bf16.msra.mxu0 %v563_v11 }
  0xaa   : > { %566 = vmatprep.subr.bf16.mxu0 %v565_v12 }
  0xad   : > { %568 = vmatpush1.bf16.msra.mxu0 %v567_v17 }
  0xae   : > { %570 = vmatprep.subr.bf16.mxu0 %v569_v18 }
  0xb1   : > { %572 = vmatpush1.bf16.msra.mxu0 %v571_v23 }
  0xb2   : > { %574 = vmatprep.subr.bf16.mxu0 %v573_v24 }
  0xb5   : > { %576 = vmatpush1.bf16.msra.mxu0 %v575_v29 }
  0xb6   : > { %578 = vmatprep.subr.bf16.mxu0 %v577_v30 }
  0xb9   : > { %580 = vmatpush1.bf16.msra.mxu0 %v579_v33 }
  0xbc   : > { %360 = vmatmul.mubr.f32.vlgmr.msra.gmra.mrb[0].mxu0 %v229_v34 }
 0x18f   : > { %v361_v37 = vpop.f32.mrb[0].mxu0 }
 0x190   : > { %v366_v38 = vadd.f32 %v361_v37, %v227_v35  ;;  %v363_v39 = vpop.f32.mrb[1].mxu0 }
 0x191   : > { %v367_v40 = vadd.f32 %v363_v39, %v228_v36 }
 0x192   : > { %368 = vst [vmem:[%s1212_s17] sm:$0xff] %v366_v38 }
 0x193   : > { %369 = vst [vmem:[%s1212_s17 + $0x8] sm:$0xff] %v367_v40 }
 0x194   : > { %789 = shalt.err (!%p786_p10)
}
 0x195   : > { %s790_s28 = scalar_lea.hbm %s1292_s21, 256  ;;  %s794_s6 = scalar_lea.hbm %s1375_s2, 512 }
 0x196   : > { %p791_p7 = scmp.ne.s32.totalorder %s1292_s21, %s790_s28  ;;  %p795_p0 = scmp.lt.u32.totalorder %s1292_s21, %s1375_s2 }
 0x197   : > { %p796_p11 = scmp.lt.u32.totalorder %s794_s6, %s790_s28  ;;  %p798_p5 = scmp.lt.u32.totalorder %s790_s28, %s1292_s21 }
 0x198   : > { %p792_p1 = pnand %p791_p7, %p1406_p13 }
 0x199   : > { %p797_p4 = por %p796_p11, %p795_p0 }
 0x19a   : > { %p793_p3 = pneg %p792_p1 }
 0x19b   : > { %p799_p2 = por %p798_p5, %p797_p4 }
 0x19d   : > { %p800_p12 = pnand %p799_p2, %p793_p3 }
 0x19f   : > { %803 = shalt.err (!%p800_p12)
}
 0x1a0   : > { %585 = dma.vmem_to_hbm [thread:$0]  (%p1406_p13), %s1294_s4, 256, %s1292_s21, %s371_s0  }
 0x1a1 PF: > { %p599_p6 = scmp.ge.s32.totalorder %s926_s22, 2  ;;  %s397_s26 = sand.u32 1, %s874_s9  }
 0x1a2   : > { %p1407_p9 = scmp.ne.s32.totalorder %s1397_s30, 0  ;;  %s398_s5 = scalar_lea.sflag [#allocation4], %s397_s26 }
 0x1a4   : > { %p595_p8 = pnand %p599_p6, %p1407_p9 }
 0x1a6   : > { %869 = dma.done.wait (!%p595_p8), %s398_s5, 256  }
 0x1a7   : > { %871 = vsyncadd (!%p595_p8), %s398_s5, 4294967040  ;;  %s21_s22 = sadd.s32 1, %s926_s22   ;;  %s1409_s12 = sld [smem:[#allocation17_spill]] }
 0x1a8   : > { %p1326_p10 = scmp.ge.s32.totalorder %s21_s22, 6   ;;  %s1410_s18 = sld [smem:[#allocation16_spill]] }
 0x1a9   : > { %s1411_s4 = sld [smem:[#allocation11_spill]]  ;;  %s1412_s27 = sld [smem:[#allocation15_spill]] }
 0x1aa   : > { %s1413_s19 = sld [smem:[#allocation12_spill]]  ;;  %s1414_s30 = sld [smem:[#allocation13_spill]] }
 0x1ab   : > { %s1415_s21 = sld [smem:[#allocation14_spill]]  ;;  %s1417_s9 = smov %s878_s10 }
 0x1ac   : > { %s1418_s10 = smov %s882_s11  ;;  %s1423_s15 = smov %s902_s16 }
 0x1ad   : > { %s1419_s11 = smov %s1409_s12  ;;  %s1420_s12 = smov %s890_s13 }
 0x1ae   : > { %s1421_s13 = smov %s894_s14  ;;  %s1422_s14 = smov %s1410_s18 }
 0x1af   : > { %s1424_s16 = smov %s1411_s4  ;;  %s1425_s17 = smov %s1412_s27 }
 0x1b0   : > { %s1426_s18 = smov %s918_s20  ;;  %s1427_s20 = smov %s1414_s30 }
 0x1b1   :  { %20 = sbr.rel (!%p1326_p10) target bundleno = 14 (0xe), region = 90 }
 0x1b8   :  { %403 = vsyncpa [#allocation3], 1 }
 0x1b9   :  { %405 = vsyncpa [#allocation3 + $0x1], 1 }
 0x1ba   :  { %406 = vsyncpa [#allocation6], 1 }
 0x1bb   :  { %408 = vsyncpa [#allocation6 + $0x1], 1 }
 0x1bc   :  { %409 = vsyncpa [#allocation4], 1 }
 0x1bd   :  { %411 = vsyncpa [#allocation4 + $0x1], 1 }

</bundles_post_ra>
